<compile_context>
chip_gen: v5e
topology: v5e:2x2
jax: 0.10.0
libtpu: 0.0.40
codegen_flags: <defaults>
</compile_context>

<pallas_src>
import functools

import jax
import jax.numpy as jnp
from jax import lax
from jax.experimental import pallas as pl
from jax.experimental.pallas import tpu as pltpu


# --------------------------------------------------------------------------
# Pallas kernels
# --------------------------------------------------------------------------
def _bmm_kernel(a_ref, b_ref, o_ref, acc_ref, *, activation):
    """One (parity, m, n, k) grid step of the batched matmul."""
    @pl.when(pl.program_id(3) == 0)
    def _():
        acc_ref[...] = jnp.zeros_like(acc_ref)

    acc_ref[...] += jnp.dot(a_ref[0], b_ref[0],
                            preferred_element_type=jnp.float32)

    @pl.when(pl.program_id(3) == pl.num_programs(3) - 1)
    def _():
        r = acc_ref[...]
        if activation == "tanh":            # fused epilogue (last layer)
            r = jnp.tanh(r)
        o_ref[0] = r.astype(o_ref.dtype)


def pallas_bmm(a, b, activation=None):
    """Batched matmul a[P,M,K] @ b[P,K,N] -> [P,M,N] (f32 MXU accumulation)."""
    P, M, K = a.shape
    P2, K2, N = b.shape
    assert P == P2 and K == K2
    tm = min(M, 1024)
    tk = min(K, 2048)
    # When M is tiny, widen the N tile so the grid stays small and the output
    # store stays lane-dense.
    tn = min(N, 512 if M >= 256 else 4096)
    assert M % tm == 0 and K % tk == 0 and N % tn == 0
    grid = (P, M // tm, N // tn, K // tk)
    kernel = functools.partial(_bmm_kernel, activation=activation)
    return pl.pallas_call(
        kernel,
        out_shape=jax.ShapeDtypeStruct((P, M, N), jnp.float32),
        grid_spec=pltpu.PrefetchScalarGridSpec(
            num_scalar_prefetch=0,
            grid=grid,
            in_specs=[pl.BlockSpec((1, tm, tk), lambda p, i, j, k: (p, i, k)),
                      pl.BlockSpec((1, tk, tn), lambda p, i, j, k: (p, k, j))],
            out_specs=pl.BlockSpec((1, tm, tn), lambda p, i, j, k: (p, i, j)),
            scratch_shapes=[pltpu.VMEM((tm, tn), jnp.float32)]),
        compiler_params=pltpu.CompilerParams(
            dimension_semantics=("parallel", "parallel", "parallel",
                                 "arbitrary"),
            vmem_limit_bytes=32 * 1024 * 1024),
    )(a, b)


def _bn_leaky_kernel(x_ref, scale_ref, shift_ref, o_ref):
    y = x_ref[...] * scale_ref[...] + shift_ref[...]
    o_ref[...] = jnp.where(y >= 0, y, 0.1 * y)


def pallas_bn_leaky(x2d, scale, shift):
    """Per-channel affine (folded BatchNorm) + LeakyReLU(0.1) on [M, C]."""
    M, C = x2d.shape
    tm = min(M, 1024)
    assert M % tm == 0
    return pl.pallas_call(
        _bn_leaky_kernel,
        out_shape=jax.ShapeDtypeStruct((M, C), jnp.float32),
        grid_spec=pltpu.PrefetchScalarGridSpec(
            num_scalar_prefetch=0,
            grid=(M // tm,),
            in_specs=[pl.BlockSpec((tm, C), lambda i: (i, 0)),
                      pl.BlockSpec((1, C), lambda i: (0, 0)),
                      pl.BlockSpec((1, C), lambda i: (0, 0))],
            out_specs=pl.BlockSpec((tm, C), lambda i: (i, 0))),
        compiler_params=pltpu.CompilerParams(
            dimension_semantics=("parallel",)),
    )(x2d, scale, shift)


# --------------------------------------------------------------------------
# ConvTranspose2d(k=4, s=2, p=1) via sub-pixel (parity) decomposition
# --------------------------------------------------------------------------
def _subpixel_convT_operands(x, w, dtype=jnp.bfloat16):
    """x: [N,H,W,Cin] NHWC;  w: [Cin,Cout,4,4] (PyTorch ConvT layout).

    Output pixel (2m+py, 2n+px) only touches 4 of the 16 kernel taps:
      rows:  py=0 -> x[m]*w[ky=1] + x[m-1]*w[ky=3]
             py=1 -> x[m+1]*w[ky=0] + x[m]*w[ky=2]     (same for columns)
    so the layer is 4 independent matmuls A_p[M,4*Cin] @ B_p[4*Cin,Cout].
    Returns (A [4,M,4*Cin], B [4,4*Cin,Cout_pad], (N,H,W,Cout,Cout_pad)).
    """
    N, H, W, Cin = x.shape
    Cout = w.shape[1]
    xb = jnp.pad(x.astype(dtype), ((0, 0), (1, 1), (1, 1), (0, 0)))
    wb = w.astype(dtype)

    a_par, b_par = [], []
    for py in range(2):
        for px in range(2):
            taps_a, taps_b = [], []
            for jy in range(2):
                for jx in range(2):
                    taps_a.append(
                        xb[:, py + jy:py + jy + H, px + jx:px + jx + W, :])
                    ky = 3 - py - 2 * jy
                    kx = 3 - px - 2 * jx
                    taps_b.append(wb[:, :, ky, kx])            # [Cin, Cout]
            a_par.append(jnp.concatenate(taps_a, axis=-1)
                         .reshape(N * H * W, 4 * Cin))
            b_par.append(jnp.concatenate(taps_b, axis=0))      # [4*Cin, Cout]
    a = jnp.stack(a_par, axis=0)                               # [4, M, 4*Cin]
    b = jnp.stack(b_par, axis=0)                               # [4, 4*Cin, Cout]

    cout_pad = ((Cout + 127) // 128) * 128                     # lane-dense N
    if cout_pad != Cout:
        b = jnp.pad(b, ((0, 0), (0, 0), (0, cout_pad - Cout)))
    return a, b, (N, H, W, Cout, cout_pad)


def _interleave_parities(y, n, h, w, cout):
    """[4(=py*2+px), n*h*w, cout] -> [n, 2h, 2w, cout]."""
    y = y.reshape(2, 2, n, h, w, cout)
    return jnp.transpose(y, (2, 3, 0, 4, 1, 5)).reshape(n, 2 * h, 2 * w, cout)


def conv_transpose_s2(x, w, dtype=jnp.bfloat16, activation=None):
    """Full ConvTranspose2d(k=4, s=2, p=1), NHWC in / NHWC out."""
    a, b, (n, h, w_sp, cout, cout_pad) = _subpixel_convT_operands(x, w, dtype)
    y = pallas_bmm(a, b, activation=activation)        # [4, n*h*w, cout_pad]
    return _interleave_parities(y[..., :cout], n, h, w_sp, cout)


def _bn_fold(y2d, gamma, beta, eps=1e-5):
    # training-mode BatchNorm2d: biased batch statistics over (N, H, W).
    # (tiny reduction; kept as XLA glue -- could be folded into the matmul
    #  epilogue as extra sum/sumsq accumulators for a further small win)
    mean = jnp.mean(y2d, axis=0)
    var = jnp.mean(jnp.square(y2d - mean), axis=0)
    scale = gamma / jnp.sqrt(var + eps)
    shift = beta - mean * scale
    return scale.reshape(1, -1), shift.reshape(1, -1)


# --------------------------------------------------------------------------
# Generator forward
# --------------------------------------------------------------------------
def generator_forward(z, params):
    """z: [N, latent_dim] -> output [N, out_channel, 64, 64] (NCHW)."""
    n, latent = z.shape

    # ---- layer 0: ConvT(latent->1024, k4, s1, p0) on a 1x1 input ----
    # out[n, ky, kx, co] = sum_ci z[n, ci] * w0[ci, co, ky, kx]  (pure matmul)
    w0 = params["w0"]
    c0 = w0.shape[1]
    b0 = jnp.transpose(w0, (0, 2, 3, 1)).reshape(latent, 16 * c0)
    y = pallas_bmm(z.astype(jnp.bfloat16)[None],
                   b0.astype(jnp.bfloat16)[None])[0]           # [n, 16*c0]
    y2d = y.reshape(n * 16, c0)
    scale, shift = _bn_fold(y2d, params["gamma0"], params["beta0"])
    h = pallas_bn_leaky(y2d, scale, shift).reshape(n, 4, 4, c0)

    # ---- layers 1-3: ConvT(k4, s2, p1) + BatchNorm + LeakyReLU(0.1) ----
    for i in range(1, 4):
        h = conv_transpose_s2(h, params[f"w{i}"])
        nb, ho, wo, cout = h.shape
        y2d = h.reshape(nb * ho * wo, cout)
        scale, shift = _bn_fold(y2d, params[f"gamma{i}"], params[f"beta{i}"])
        h = pallas_bn_leaky(y2d, scale, shift).reshape(nb, ho, wo, cout)

    # ---- layer 4: ConvT(k4, s2, p1) with tanh fused into the matmul ----
    h = conv_transpose_s2(h, params["w4"], activation="tanh")

    return jnp.transpose(h, (0, 3, 1, 2))                      # NCHW


def init_params(key, latent_dim, out_channel):
    chans = [latent_dim, 1024, 512, 256, 128, out_channel]
    params = {}
    for i in range(5):
        key, kw = jax.random.split(key)
        cin, cout = chans[i], chans[i + 1]
        params[f"w{i}"] = 0.05 * jax.random.normal(
            kw, (cin, cout, 4, 4), jnp.float32)          # PyTorch ConvT layout
        if i < 4:
            key, kg, kb = jax.random.split(key, 3)
            params[f"gamma{i}"] = 1.0 + 0.1 * jax.random.normal(
                kg, (cout,), jnp.float32)
            params[f"beta{i}"] = 0.1 * jax.random.normal(
                kb, (cout,), jnp.float32)
    return params


def _check_conv_transpose_lowering():
    """Validate the sub-pixel ConvTranspose2d lowering against lax (f32)."""
    key = jax.random.PRNGKey(42)
    kx, kw = jax.random.split(key)
    x = jax.random.normal(kx, (1, 4, 4, 8), jnp.float32)       # NHWC
    w = jax.random.normal(kw, (8, 4, 4, 4), jnp.float32)       # [Cin,Cout,4,4]
    got = conv_transpose_s2(x, w, dtype=jnp.float32)
    ref = lax.conv_general_dilated(
        x, jnp.transpose(w[:, :, ::-1, ::-1], (2, 3, 0, 1)),   # HWIO, flipped
        window_strides=(1, 1), padding=[(2, 2), (2, 2)],
        lhs_dilation=(2, 2),
        dimension_numbers=("NHWC", "HWIO", "NHWC"))
    err = float(jnp.max(jnp.abs(got - ref)))
    assert err < 1e-3, err


if __name__ == "__main__":
    # sanity-check the ConvTranspose lowering itself (exact f32 path)
    _check_conv_transpose_lowering()

    latent_dim = 32
    batch = 2
    out_channel = 1

    key = jax.random.PRNGKey(0)
    key, kz = jax.random.split(key)
    z = jax.random.normal(kz, (batch, latent_dim), jnp.float32)
    params = init_params(key, latent_dim, out_channel)

    fwd = jax.jit(generator_forward)
    out = fwd(z, params)
    jax.block_until_ready(out)

    assert out.shape == (batch, out_channel, 64, 64), out.shape
    assert bool(jnp.all(jnp.isfinite(out)))
    assert bool(jnp.max(jnp.abs(out)) <= 1.0 + 1e-6)           # tanh range
    print("KERNEL_OK")
</pallas_src>

<mosaic_0001>
module attributes {stable_mosaic.version = 11 : i64} {
  func.func @_bmm_kernel(%arg0: i32, %arg1: i32, %arg2: i32, %arg3: i32, %arg4: memref<1x16x32xf32, #tpu.memory_space<vmem>>, %arg5: memref<1x32x128xf32, #tpu.memory_space<vmem>>, %arg6: memref<1x16x128xf32, #tpu.memory_space<vmem>>, %arg7: memref<16x128xf32, #tpu.memory_space<vmem>>) attributes {dimension_semantics = [#tpu.dimension_semantics<parallel>, #tpu.dimension_semantics<parallel>, #tpu.dimension_semantics<parallel>, #tpu.dimension_semantics<arbitrary>], iteration_bounds = array<i64: 4, 1, 1, 1>, scalar_prefetch = 0 : i64, scratch_operands = 1 : i64, tpu.core_type = #tpu.core_type<tc>, window_params = [{transform_indices = @transform_0, window_bounds = array<i64: 1, 16, 32>}, {transform_indices = @transform_1, window_bounds = array<i64: 1, 32, 128>}, {transform_indices = @transform_2, window_bounds = array<i64: 1, 16, 128>}]} {
    %c0_i32 = arith.constant 0 : i32
    %0 = arith.cmpi eq, %arg3, %c0_i32 : i32
    %1 = arith.extui %0 : i1 to i32
    %c0_i32_0 = arith.constant 0 : i32
    %2 = arith.cmpi ne, %1, %c0_i32_0 : i32
    scf.if %2 {
      %cst_12 = arith.constant 0.000000e+00 : f32
      %14 = vector.broadcast %cst_12 : f32 to vector<16x128xf32>
      %c0_13 = arith.constant 0 : index
      %c0_14 = arith.constant 0 : index
      %15 = vector.load %arg7[%c0_13, %c0_14] : memref<16x128xf32, #tpu.memory_space<vmem>>, vector<16x128xf32>
      tpu.vector_store %arg7[%c0_13, %c0_14], %14 {strides = array<i32>} : memref<16x128xf32, #tpu.memory_space<vmem>>, vector<16x128xf32>,
    } else {
    }
    %c0 = arith.constant 0 : index
    %c0_1 = arith.constant 0 : index
    %3 = vector.load %arg7[%c0, %c0_1] : memref<16x128xf32, #tpu.memory_space<vmem>>, vector<16x128xf32>
    %c0_2 = arith.constant 0 : index
    %c0_3 = arith.constant 0 : index
    %c0_4 = arith.constant 0 : index
    %4 = vector.load %arg4[%c0_2, %c0_3, %c0_4] : memref<1x16x32xf32, #tpu.memory_space<vmem>>, vector<1x16x32xf32>
    %5 = vector.shape_cast %4 : vector<1x16x32xf32> to vector<16x32xf32>
    %c0_5 = arith.constant 0 : index
    %c0_6 = arith.constant 0 : index
    %c0_7 = arith.constant 0 : index
    %6 = vector.load %arg5[%c0_5, %c0_6, %c0_7] : memref<1x32x128xf32, #tpu.memory_space<vmem>>, vector<1x32x128xf32>
    %7 = vector.shape_cast %6 : vector<1x32x128xf32> to vector<32x128xf32>
    %cst = arith.constant dense<0.000000e+00> : vector<16x128xf32>
    %8 = tpu.matmul %5, %7, %cst {dimension_numbers = #tpu.dot_dimension_numbers<[1], [0], [0], [1], [0, 0, 1, 1], [], []>} : vector<16x32xf32>, vector<32x128xf32>, vector<16x128xf32> -> vector<16x128xf32>
    %9 = arith.addf %3, %8 : vector<16x128xf32>
    %c0_8 = arith.constant 0 : index
    %c0_9 = arith.constant 0 : index
    %10 = vector.load %arg7[%c0_8, %c0_9] : memref<16x128xf32, #tpu.memory_space<vmem>>, vector<16x128xf32>
    tpu.vector_store %arg7[%c0_8, %c0_9], %9 {strides = array<i32>} : memref<16x128xf32, #tpu.memory_space<vmem>>, vector<16x128xf32>,
    %c0_i32_10 = arith.constant 0 : i32
    %11 = arith.cmpi eq, %arg3, %c0_i32_10 : i32
    %12 = arith.extui %11 : i1 to i32
    %c0_i32_11 = arith.constant 0 : i32
    %13 = arith.cmpi ne, %12, %c0_i32_11 : i32
    scf.if %13 {
      %c0_12 = arith.constant 0 : index
      %c0_13 = arith.constant 0 : index
      %14 = vector.load %arg7[%c0_12, %c0_13] : memref<16x128xf32, #tpu.memory_space<vmem>>, vector<16x128xf32>
      %c0_14 = arith.constant 0 : index
      %c0_15 = arith.constant 0 : index
      %c0_16 = arith.constant 0 : index
      %15 = vector.load %arg6[%c0_14, %c0_15, %c0_16] : memref<1x16x128xf32, #tpu.memory_space<vmem>>, vector<1x16x128xf32>
      %16 = vector.shape_cast %15 : vector<1x16x128xf32> to vector<16x128xf32>
      %17 = vector.shape_cast %14 : vector<16x128xf32> to vector<1x16x128xf32>
      tpu.vector_store %arg6[%c0_14, %c0_15, %c0_16], %17 {strides = array<i32>} : memref<1x16x128xf32, #tpu.memory_space<vmem>>, vector<1x16x128xf32>,
    } else {
    }
    return
  }
  func.func @transform_0(%arg0: i32, %arg1: i32, %arg2: i32, %arg3: i32) -> (i32, i32, i32) {
    %c0_i32 = arith.constant 0 : i32
    return %arg0, %arg1, %arg3 : i32, i32, i32
  }
  func.func @transform_1(%arg0: i32, %arg1: i32, %arg2: i32, %arg3: i32) -> (i32, i32, i32) {
    %c0_i32 = arith.constant 0 : i32
    return %arg0, %arg3, %arg2 : i32, i32, i32
  }
  func.func @transform_2(%arg0: i32, %arg1: i32, %arg2: i32, %arg3: i32) -> (i32, i32, i32) {
    %c0_i32 = arith.constant 0 : i32
    return %arg0, %arg1, %arg2 : i32, i32, i32
  }
}

</mosaic_0001>

<bundles_post_ra>
// kernel: tpu_custom_call.1
= control target key start
LH: loop header
LB: loop body
LE: loop exit
PB: predicated region body
PF: predicated region fallthrough
CT: control target
= control target key end

     0   :  { %7 = vsyncpa [#allocation4], 0  ;;  %s861_s0 = inlined_call_operand.hbm [shape: f32[4,16,32], index: 0, kind: input, shape index: {}]   ;;  %s862_s1 = inlined_call_operand.hbm [shape: f32[4,32,128], index: 1, kind: input, shape index: {}]   ;;  %s863_s2 = inlined_call_operand.hbm [shape: f32[4,16,128], index: 2, kind: output, shape index: {}]  }
   0x1   :  { %9 = vsyncpa [#allocation4 + $0x1], 0 }
   0x2   :  { %10 = vsyncpa [#allocation7], 0 }
   0x3   :  { %12 = vsyncpa [#allocation7 + $0x1], 0 }
   0x4   :  { %13 = vsyncpa [#allocation5], 0 }
   0x5   :  { %15 = vsyncpa [#allocation5 + $0x1], 0  ;;  %s715_s9 = smov 0   ;;  %s717_s10 = smov 0  }
   0x6   :  { %s719_s11 = smov 0   ;;  %s721_s12 = smov 0  }
   0x7   :  { %s723_s13 = smov 0   ;;  %s725_s14 = smov 0  }
   0x8 LB: > { %s449_s15 = sadd.s32 4294967295, %s694_s14   ;;  %s450_s16 = sadd.s32 4294967294, %s694_s14   ;;  %s694_s14 = sphi %s725_s14, %s21_s14   ;;  %s690_s13 = sphi %s723_s13, %s873_s13   ;;  %s686_s12 = sphi %s721_s12, %s872_s12   ;;  %s682_s11 = sphi %s719_s11, %s871_s11   ;;  %s678_s10 = sphi %s717_s10, %s870_s10   ;;  %s674_s9 = sphi %s715_s9, %s869_s9  }
   0x9   : > { %s47_s17 = sadd.s32 1, %s690_s13  ;;  %s58_s18 = sadd.s32 1, %s682_s11 }
   0xa   : > { %p49_p0 = scmp.ge.s32.totalorder %s47_s17, 4  ;;  %p65_p1 = scmp.ne.s32.totalorder %s682_s11, %s678_s10 }
   0xb   : > { %p66_p2 = scmp.eq.s32.totalorder %s694_s14, 0  ;;  %p71_p3 = scmp.ne.s32.totalorder %s678_s10, %s674_s9 }
   0xc   : > { %s875_s17 = smov (%p49_p0, %s47_s17), 0  ;;  %p72_p5 = scmp.eq.s32.totalorder %s449_s15, 0 }
   0xd   : > { %p756_p4 = por %p66_p2, %p65_p1  ;;  %s51_s20 = ssub.s32 %s690_s13, %s875_s17 }
   0xe   : > { %p129_p6 = scmp.eq.s32.totalorder %s449_s15, 3  ;;  %p56_p7 = scmp.eq.s32.totalorder %s51_s20, 0 }
   0xf   : > { %p762_p8 = por %p72_p5, %p71_p3  ;;  %p135_p10 = scmp.eq.s32.totalorder %s450_s16, 3 }
  0x10   : > { %p766_p9 = por %p129_p6, %p65_p1  ;;  %p494_p12 = scmp.lt.s32.totalorder %s694_s14, 4 }
  0x11   : > { %s771_s23 = scalar_select %p56_p7, %s682_s11, %s58_s18  }
  0x12   : > { %p773_p11 = por %p135_p10, %p71_p3  ;;  %s779_s25 = sand.u32 1, %s682_s11  }
  0x13   : > { %s453_s26 = sshll.u32 %s779_s25, 4  ;;  %s470_s27 = sshll.u32 %s690_s13, 4 }
  0x14   : > { %s167_s30 = scalar_lea.hbm %s861_s0, %s470_s27  ;;  %s159_s3 = scalar_lea.vmem [#allocation3], %s453_s26 }
  0x15   : > { %s170_s4 = sshll.u32 %s159_s3, 4  ;;  %s168_s5 = sshll.u32 %s167_s30, 4  ;;  %s171_s4 = int_to_ptr.vmem [resolvable:$true] %s170_s4  ;;  %s169_s5 = int_to_ptr.hbm [resolvable:$true] %s168_s5 }
  0x16   : > { %p788_p13 = pnand %p494_p12, %p756_p4  ;;  %p459_p0 = scmp.ge.s32.totalorder %s694_s14, 1 }
  0x17   : > { %s156_s7 = scalar_lea.sflag [#allocation4], %s779_s25  ;;  %s696_s8 = smov 128  }
  0x18   : > { %s697_s15 = smov 8   ;;  %p203_p1 = scmp.lt.s32.totalorder %s694_s14, 5 }
  0x19   : > { %486 = dma.hbm_to_vmem [thread:$0]  (!%p788_p13), %s169_s5, 256, %s171_s4, %s156_s7, %s696_s8, %s696_s8, %s697_s15  }
  0x1a   : > { %s456_s16 = sshll.u32 %s779_s25, 5  ;;  %s471_s18 = sshll.u32 %s690_s13, 5 }
  0x1b   : > { %p204_p2 = pnand %p459_p0, %p203_p1  ;;  %s192_s19 = scalar_lea.hbm %s862_s1, %s471_s18 }
  0x1c   : > { %s184_s27 = scalar_lea.vmem [#allocation6], %s456_s16  ;;  %s193_s29 = sshll.u32 %s192_s19, 4  ;;  %s194_s29 = int_to_ptr.hbm [resolvable:$true] %s193_s29 }
  0x1d   : > { %s195_s28 = sshll.u32 %s184_s27, 4  ;;  %s181_s30 = scalar_lea.sflag [#allocation7], %s779_s25  ;;  %s196_s28 = int_to_ptr.vmem [resolvable:$true] %s195_s28 }
  0x1e   : > { %489 = dma.hbm_to_vmem [thread:$0]  (!%p788_p13), %s194_s29, 512, %s196_s28, %s181_s30, %s696_s8, %s696_s8, %s697_s15  }
  0x1f   : > { %207 = sbr.rel (%p204_p2) target bundleno = 179 (0xb3), region = 28  ;;  %s806_s3 = sand.u32 (!%p204_p2), 1, %s678_s10  }
  0x20   : > { %s460_s4 = sshll.u32 (!%p204_p2), %s806_s3, 4  ;;  %s210_s5 = scalar_lea.sflag (!%p204_p2), [#allocation4], %s806_s3 }
  0x21   : > { %s213_s7 = scalar_lea.vmem (!%p204_p2), [#allocation3], %s460_s4 }
  0x24   : > { %661 = dma.done.wait (%p762_p8), %s210_s5, 256  }
  0x25   : > { %663 = vsyncadd (%p762_p8), %s210_s5, 4294967040  ;;  %s461_s25 = sshll.u32 %s806_s3, 5  ;;  %s220_s6 = scalar_lea.sflag [#allocation7], %s806_s3 }
  0x26   : > { %s223_s8 = scalar_lea.vmem [#allocation6], %s461_s25 }
  0x27   : > { %665 = dma.done.wait (%p762_p8), %s220_s6, 512  }
  0x28   : > { %667 = vsyncadd (%p762_p8), %s220_s6, 4294966784  ;;  %v266_v0 = vld [vmem:[%s223_s8 + $0x18] sm:$0xff]  ;;  %v265_v1 = vld [vmem:[%s223_s8 + $0x10] sm:$0xff]  ;;  %vm267_vm0 = vcmask 261120   ;;  %s472_s21 = sshll.u32 %s686_s12, 4  ;;  %s249_s20 = scalar_lea.vmem [#allocation8], %s460_s4 }
  0x29   : > { %286 = vmatpush.msra.mxu0 %v266_v0  ;;  %473 = vmatpush.msra.mxu1 %v266_v0  ;;  %v264_v2 = vld [vmem:[%s223_s8 + $0x8] sm:$0xff]  ;;  %v263_v3 = vld [vmem:[%s223_s8] sm:$0xff]  ;;  %s323_s18 = scalar_lea.hbm %s863_s2, %s472_s21  ;;  %s324_s26 = sshll.u32 %s249_s20, 4  ;;  %s325_s26 = int_to_ptr.vmem [resolvable:$true] %s324_s26 }
  0x2a   : > { %v261_v4 = vld [vmem:[%s213_s7] sm:$0xff]  ;;  %v262_v5 = vld [vmem:[%s213_s7 + $0x8] sm:$0xff]  ;;  %s326_s19 = sshll.u32 %s323_s18, 4  ;;  %s309_s27 = scalar_lea.sflag [#allocation5], %s806_s3  ;;  %s327_s19 = int_to_ptr.hbm [resolvable:$true] %s326_s19 }
  0x2b   : > { %287 = vmatpush.msra.mxu0 %v265_v1  ;;  %474 = vmatpush.msra.mxu1 %v265_v1  ;;  %s622_s28 = sshra.s32 %s327_s19, 4  ;;  %s628_s4 = scalar_lea.hbm %s863_s2, 64  ;;  %s623_s28 = int_to_ptr.hbm [resolvable:$true] %s622_s28 }
  0x2c   : > { %s624_s29 = scalar_lea.hbm %s623_s28, 16  ;;  %p629_p6 = scmp.lt.s32.totalorder %s623_s28, %s863_s2 }
  0x2d   : > { %288 = vmatpush.msra.mxu0 %v264_v2  ;;  %475 = vmatpush.msra.mxu1 %v264_v2  ;;  %p625_p3 = scmp.ne.s32.totalorder %s623_s28, %s624_s29  ;;  %p630_p7 = scmp.lt.s32.totalorder %s628_s4, %s624_s29 }
  0x2f   : > { %289 = vmatpush.msra.mxu0 %v263_v3  ;;  %476 = vmatpush.msra.mxu1 %v263_v3  ;;  %p626_p4 = pnand %p625_p3, %p766_p9  ;;  %p631_p8 = por %p630_p7, %p629_p6 }
  0x30   : > { %463 = vmatmul.msk.f32.vlgmr.msra.gmra.mxu0 %vm267_vm0, %v261_v4  ;;  %464 = vmatmul.msk.f32.vlgmr.msra.gmra.mxu1 %vm267_vm0, %v262_v5 }
  0x31   : > { %p627_p5 = pneg %p626_p4 }
  0x33   : > { %p632_p10 = pnand %p631_p8, %p627_p5 }
  0xad   : > { %v291_v6 = vpop.f32.mrf.mxu0  ;;  %v294_v7 = vpop.f32.mrf.mxu1 }
  0xae   : > { %306 = vst [vmem:[%s249_s20] sm:$0xff] %v291_v6 }
  0xaf   : > { %307 = vst [vmem:[%s249_s20 + $0x8] sm:$0xff] %v294_v7 }
  0xb0   : > { %635 = shalt.err (!%p632_p10)
}
  0xb1   : > { %s698_s3 = smov 128   ;;  %s699_s25 = smov 8  }
  0xb2   : > { %481 = dma.vmem_to_hbm [thread:$0]  (%p766_p9), %s325_s26, 256, %s327_s19, %s309_s27, %s698_s3, %s698_s3, %s699_s25  }
  0xb3 PF: > { %p495_p12 = scmp.ge.s32.totalorder %s694_s14, 2  ;;  %s341_s6 = sand.u32 1, %s674_s9  }
  0xb4   : > { %s342_s8 = scalar_lea.sflag [#allocation5], %s341_s6 }
  0xb5   : > { %p491_p13 = pnand %p495_p12, %p773_p11 }
  0xb7   : > { %p492_p0 = pneg %p491_p13 }
  0xb9   : > { %669 = dma.done.wait (%p492_p0), %s342_s8, 256  }
  0xba   : > { %671 = vsyncadd (%p492_p0), %s342_s8, 4294967040  ;;  %s21_s14 = sadd.s32 1, %s694_s14   ;;  %s869_s9 = smov %s678_s10 }
  0xbb   : > { %p18_p1 = scmp.ge.s32.totalorder %s21_s14, 6   ;;  %s870_s10 = smov %s682_s11 }
  0xbc   : > { %s871_s11 = smov %s771_s23  ;;  %s872_s12 = smov %s690_s13 }
  0xbd   : > { %s873_s13 = smov %s875_s17  ;;  %20 = sbr.rel (!%p18_p1) target bundleno = 8 (0x8), region = 94 }
  0xc2   :  { %348 = vsyncpa [#allocation4], 1 }
  0xc3   :  { %350 = vsyncpa [#allocation4 + $0x1], 1 }
  0xc4   :  { %351 = vsyncpa [#allocation7], 1 }
  0xc5   :  { %353 = vsyncpa [#allocation7 + $0x1], 1 }
  0xc6   :  { %354 = vsyncpa [#allocation5], 1 }
  0xc7   :  { %356 = vsyncpa [#allocation5 + $0x1], 1 }

</bundles_post_ra>
